<compile_context>
chip_gen: v7x
topology: tpu7x:2x2x1
jax: 0.10.0
libtpu: 0.0.40
codegen_flags: <defaults>
</compile_context>

<pallas_src>
import jax
import jax.numpy as jnp
from jax.experimental import pallas as pl
from jax.experimental.pallas import tpu as pltpu


def _wsilu_kernel(x_ref, o_ref):
    x = x_ref[...]
    # Compute in f32 (mandatory on v5e: no bf16 VPU/EUP; free filler elsewhere
    # since this kernel is HBM-bound), cast back to the input dtype.
    xf = x.astype(jnp.float32)
    o_ref[...] = (jax.nn.sigmoid(4.0 * xf) * xf).astype(o_ref.dtype)


_LANE_CANDIDATES = (8192, 4096, 2048, 1024, 512, 256, 128)


def _choose_lanes(total: int):
    """Largest lane width (multiple of 128) that evenly divides `total`."""
    for lanes in _LANE_CANDIDATES:
        if total % lanes == 0:
            return lanes
    return None


def _pick_tile_rows(rows: int, lanes: int, itemsize: int,
                    target_bytes: int = 4 << 20) -> int:
    """Row-tile sized to ~target_bytes, multiple of the sublane pack, and
    capped so the (parallel) grid has at least 2 steps when possible."""
    sub = max(8, 32 // itemsize)          # 8 for f32, 16 for bf16, 32 for int8
    if rows <= sub:
        return rows                        # full extent -> always a legal block
    t = (target_bytes // (lanes * itemsize)) // sub * sub
    t = max(sub, t)
    half = -(-rows // 2)                   # cdiv(rows, 2)
    half = -(-half // sub) * sub           # round up to sublane multiple
    return min(t, half)


def wsilu(x: jax.Array) -> jax.Array:
    """Applies WSiLU elementwise. Accepts any shape (e.g. NCHW)."""
    orig_shape = x.shape
    total = int(x.size)
    if total == 0:
        return x
    dtype = x.dtype
    itemsize = jnp.dtype(dtype).itemsize

    flat = x.reshape(-1)
    lanes = _choose_lanes(total)
    pad = 0
    if lanes is None:
        # Rare fallback: element count not a multiple of 128 -> pad the flat
        # vector up to a 128-lane boundary (small, one-off copy).
        lanes = 128
        pad = (-total) % lanes
        flat = jnp.pad(flat, (0, pad))
    rows = (total + pad) // lanes
    x2d = flat.reshape(rows, lanes)

    tile_r = _pick_tile_rows(rows, lanes, itemsize)
    grid = (pl.cdiv(rows, tile_r),)        # masked tail block; no row padding

    out2d = pl.pallas_call(
        _wsilu_kernel,
        out_shape=jax.ShapeDtypeStruct((rows, lanes), dtype),
        grid_spec=pltpu.PrefetchScalarGridSpec(
            num_scalar_prefetch=0,
            grid=grid,
            in_specs=[pl.BlockSpec((tile_r, lanes), lambda i: (i, 0))],
            out_specs=pl.BlockSpec((tile_r, lanes), lambda i: (i, 0)),
        ),
        compiler_params=pltpu.CompilerParams(
            dimension_semantics=("parallel",),
            # in + out, double-buffered: 4 x block (<=4 MiB) + headroom.
            # Safe on v7x (64 MiB physical) and v5e/v6e (128 MiB).
            vmem_limit_bytes=48 << 20,
        ),
    )(x2d)

    out_flat = out2d.reshape(-1)
    if pad:
        out_flat = out_flat[:total]
    return out_flat.reshape(orig_shape)


def _wsilu_ref(x):
    xf = x.astype(jnp.float32)
    return (jax.nn.sigmoid(4.0 * xf) * xf).astype(x.dtype)


if __name__ == "__main__":
    key = jax.random.PRNGKey(0)
    # NCHW input consistent with a conv-style module.
    x = jax.random.normal(key, (2, 4, 16, 16), dtype=jnp.float32)

    y = wsilu(x)
    jax.block_until_ready(y)

    y_ref = _wsilu_ref(x)
    assert y.shape == x.shape and y.dtype == x.dtype
    assert jnp.allclose(y, y_ref, atol=1e-5, rtol=1e-5), "mismatch vs reference"

    # Extra check: a shape whose row count forces a masked tail block.
    x2 = jax.random.normal(jax.random.PRNGKey(1), (3, 8, 24, 32), dtype=jnp.float32)
    y2 = wsilu(x2)
    jax.block_until_ready(y2)
    assert jnp.allclose(y2, _wsilu_ref(x2), atol=1e-5, rtol=1e-5), "tail mismatch"

    print("KERNEL_OK")
</pallas_src>

<mosaic_0001>
module attributes {stable_mosaic.version = 11 : i64} {
  func.func @_wsilu_kernel(%arg0: i32, %arg1: memref<1x2048xf32, #tpu.memory_space<vmem>>, %arg2: memref<1x2048xf32, #tpu.memory_space<vmem>>) attributes {dimension_semantics = [#tpu.dimension_semantics<parallel>], iteration_bounds = array<i64: 1>, scalar_prefetch = 0 : i64, scratch_operands = 0 : i64, tpu.core_type = #tpu.core_type<tc>, window_params = [{transform_indices = @transform_0, window_bounds = array<i64: 1, 2048>}, {transform_indices = @transform_1, window_bounds = array<i64: 1, 2048>}]} {
    %c0 = arith.constant 0 : index
    %c0_0 = arith.constant 0 : index
    %0 = vector.load %arg1[%c0, %c0_0] : memref<1x2048xf32, #tpu.memory_space<vmem>>, vector<1x2048xf32>
    %cst = arith.constant 4.000000e+00 : f32
    %1 = vector.broadcast %cst : f32 to vector<1x2048xf32>
    %2 = arith.mulf %1, %0 : vector<1x2048xf32>
    %3 = arith.negf %2 : vector<1x2048xf32>
    %4 = math.exp %3 : vector<1x2048xf32>
    %cst_1 = arith.constant 1.000000e+00 : f32
    %5 = vector.broadcast %cst_1 : f32 to vector<1x2048xf32>
    %6 = arith.addf %5, %4 : vector<1x2048xf32>
    %7 = arith.divf %5, %6 : vector<1x2048xf32>
    %8 = arith.mulf %7, %0 : vector<1x2048xf32>
    %c0_2 = arith.constant 0 : index
    %c0_3 = arith.constant 0 : index
    %9 = vector.load %arg2[%c0_2, %c0_3] : memref<1x2048xf32, #tpu.memory_space<vmem>>, vector<1x2048xf32>
    tpu.vector_store %arg2[%c0_2, %c0_3], %8 {strides = array<i32>} : memref<1x2048xf32, #tpu.memory_space<vmem>>, vector<1x2048xf32>,
    return
  }
  func.func @transform_0(%arg0: i32) -> (i32, i32) {
    %c0_i32 = arith.constant 0 : i32
    %c0_i32_0 = arith.constant 0 : i32
    return %arg0, %c0_i32 : i32, i32
  }
  func.func @transform_1(%arg0: i32) -> (i32, i32) {
    %c0_i32 = arith.constant 0 : i32
    %c0_i32_0 = arith.constant 0 : i32
    return %arg0, %c0_i32 : i32, i32
  }
}

</mosaic_0001>

<bundles_post_ra>
// kernel: tpu_custom_call.1
= control target key start
LH: loop header
LB: loop body
LE: loop exit
PB: predicated region body
PF: predicated region fallthrough
CT: control target
= control target key end

     0   :  { %6 = vsyncpa [#allocation3], 0  ;;  %s152_s0 = inlined_call_operand.hbm [shape: f32[1,2048], index: 0, kind: input, shape index: {}]   ;;  %s153_s1 = inlined_call_operand.hbm [shape: f32[1,2048], index: 1, kind: output, shape index: {}]  }
   0x1   :  { %7 = vsyncpa [#allocation4], 0  ;;  %s116_s6 = smov [#allocation2]   ;;  %s68_s10 = scalar_lea.hbm %s152_s0, 256 }
   0x2   :  { %s14_s7 = sshll.u32 %s116_s6, 4  ;;  %p69_p0 = scmp.ne.s32.totalorder %s152_s0, %s68_s10  ;;  %s15_s7 = int_to_ptr.vmem [resolvable:$true] %s14_s7 }
   0x3   :  { %p72_p1 = scmp.lt.u32.totalorder %s68_s10, %s152_s0 }
   0x5   :  { %p74_p2 = pnand %p72_p1, %p69_p0 }
   0x7   :  { %77 = shalt.err (!%p74_p2)
}
   0x8   :  { %s78_s15 = scalar_lea.vmem %s15_s7, 256  ;;  %p83_p4 = scmp.lt.s32.totalorder %s15_s7, %s15_s7 }
   0x9   :  { %p79_p3 = scmp.ne.s32.totalorder %s15_s7, %s78_s15  ;;  %p84_p5 = scmp.lt.s32.totalorder %s78_s15, %s78_s15 }
   0xb   :  { %p85_p6 = por %p84_p5, %p83_p4 }
   0xd   :  { %p86_p7 = pnand %p85_p6, %p79_p3 }
   0xf   :  { %89 = shalt.err (!%p86_p7)
}
  0x10   :  { %17 = dma.hbm_to_vmem [thread:$0]  %s152_s0, 256, %s15_s7, [#allocation3]  }
  0x11   :  { %112 = dma.done.wait [#allocation3], 256  }
  0x12   :  { %113 = vsyncadd [#allocation3], 4294967040  ;;  %v21_v0 = vld [vmem:[#allocation2] sm:$0xff]  ;;  %v22_v1 = vld [vmem:[#allocation2 + $0x8] sm:$0xff]  ;;  %s117_s18 = smov [#allocation5]  }
  0x13   :  { %v56_v2 = vmul.f32 -4.0, %v21_v0  ;;  %v57_v3 = vmul.f32 -4.0, %v22_v1  ;;  %s47_s19 = sshll.u32 %s117_s18, 4  ;;  %s48_s19 = int_to_ptr.vmem [resolvable:$true] %s47_s19 }
  0x14   :  { %s90_s0 = scalar_lea.vmem %s48_s19, 256  ;;  %p95_p9 = scmp.lt.s32.totalorder %s48_s19, %s48_s19 }
  0x15   :  { %v27_v4 = vmul.f32 1.442695, %v56_v2  ;;  %v29_v5 = vmul.f32 1.442695, %v57_v3  ;;  %p91_p8 = scmp.ne.s32.totalorder %s48_s19, %s90_s0  ;;  %p96_p10 = scmp.lt.s32.totalorder %s90_s0, %s90_s0 }
  0x17   :  { %60 = vpow2.f32 %v27_v4  ;;  %p97_p11 = por %p96_p10, %p95_p9 }
  0x18   :  { %62 = vpow2.f32 %v29_v5 }
  0x19   :  { %p98_p12 = pnand %p97_p11, %p91_p8 }
  0x21   :  { %v61_v6 = vpop.eup %60 }
  0x22   :  { %v63_v7 = vpop.eup %62  ;;  %v31_v8 = vadd.f32 1.0, %v61_v6 }
  0x23   :  { %v32_v9 = vadd.f32 1.0, %v63_v7 }
  0x24   :  { %64 = vrcp.f32 %v31_v8 }
  0x25   :  { %66 = vrcp.f32 %v32_v9 }
  0x2e   :  { %v65_v10 = vpop.eup %64 }
  0x2f   :  { %v67_v11 = vpop.eup %66  ;;  %v37_v12 = vmul.f32 %v65_v10, %v21_v0 }
  0x30   :  { %v38_v13 = vmul.f32 %v67_v11, %v22_v1 }
  0x31   :  { %39 = vst [vmem:[#allocation5] sm:$0xff] %v37_v12 }
  0x32   :  { %40 = vst [vmem:[#allocation5 + $0x8] sm:$0xff] %v38_v13 }
  0x33   :  { %101 = shalt.err (!%p98_p12)
}
  0x34   :  { %s102_s22 = scalar_lea.hbm %s153_s1, 256 }
  0x35   :  { %p103_p13 = scmp.ne.s32.totalorder %s153_s1, %s102_s22  ;;  %p106_p0 = scmp.lt.u32.totalorder %s102_s22, %s153_s1 }
  0x37   :  { %p108_p1 = pnand %p106_p0, %p103_p13 }
  0x39   :  { %111 = shalt.err (!%p108_p1)
}
  0x3a   :  { %50 = dma.vmem_to_hbm [thread:$0]  %s48_s19, 256, %s153_s1, [#allocation4]  }
  0x3b   :  { %114 = dma.done.wait [#allocation4], 256  }
  0x3c   :  { %115 = vsyncadd [#allocation4], 4294967040 }
  0x3d   :  { %54 = vsyncpa [#allocation3], 1 }
  0x3e   :  { %55 = vsyncpa [#allocation4], 1 }

</bundles_post_ra>
